<compile_context>
chip_gen: v6e
topology: v6e:2x2x1
jax: 0.10.0
libtpu: 0.0.40
codegen_flags: <defaults>
</compile_context>

<pallas_src>
import functools

import jax
import jax.numpy as jnp
from jax import lax
from jax.experimental import pallas as pl
from jax.experimental.pallas import tpu as pltpu


# --------------------------------------------------------------------------- #
# Pass 1: per-row stats  (S_i, p_i, exp(p_i)) from streamed (TM, B) tiles.
# --------------------------------------------------------------------------- #
def _row_stats_kernel(logits_ref, s_ref, p_ref, ep_ref, *, inv_temperature):
    i = pl.program_id(0)
    l = logits_ref[...].astype(jnp.float32)            # (TM, B), cast in-kernel
    TM, B = l.shape

    # Diagonal of this row tile: global row r_g = i*TM + r has its diagonal
    # element at column i*TM + r.  Single (TM, B) mask, lane reduce only.
    row = lax.broadcasted_iota(jnp.int32, (TM, B), 0)
    col = lax.broadcasted_iota(jnp.int32, (TM, B), 1)
    diag_mask = col == row + i * TM

    p = jnp.sum(jnp.where(diag_mask, l, 0.0), axis=1, keepdims=True)   # (TM, 1)

    if inv_temperature == 1.0:                   # static Python float -> trace-time
        scaled = l
    else:
        scaled = l * inv_temperature
    s = jnp.sum(jnp.exp(scaled), axis=1, keepdims=True)                # (TM, 1)

    s_ref[...] = s
    p_ref[...] = p
    ep_ref[...] = jnp.exp(p)                      # only B diagonal exps total


# --------------------------------------------------------------------------- #
# Pass 2: per-row partial loss  sum_j log(S_i - exp(p_j)) - B * p_i.
# --------------------------------------------------------------------------- #
def _row_loss_kernel(s_ref, p_ref, ep_row_ref, out_ref, *, batch):
    s = s_ref[...]                                # (TM, 1) f32
    p = p_ref[...]                                # (TM, 1) f32
    ep = ep_row_ref[...]                          # (1, B)  f32  (same block every step)
    den = s - ep                                  # (TM, B) broadcast in VMEM
    # No positivity guard / stabilization: faithful to the PyTorch module.
    row_log = jnp.sum(jnp.log(den), axis=1, keepdims=True)             # (TM, 1)
    out_ref[...] = row_log - jnp.float32(batch) * p


def _pick_row_tile(B, bytes_budget=8 << 20):
    """Largest row tile TM (multiple of 8 that divides B) within a byte budget."""
    if B % 8 != 0:
        return B                                  # single full-extent tile (legal)
    # ~6 live f32 copies of a (TM, B) tile (double-buffered input + temporaries).
    max_tm = bytes_budget // (6 * 4 * max(B, 1))
    tm = min(512, B, (max_tm // 8) * 8)
    tm = max(tm, 8)
    while B % tm != 0:
        tm -= 8
    return tm


def infonce_loss(logits, temperature=1.0, tm=None):
    """Pallas TPU implementation of InfoNCELoss.forward(logits)."""
    B = logits.shape[0]
    assert logits.shape == (B, B), "InfoNCE expects a square (B, B) logits matrix"
    temperature = float(temperature)
    inv_temperature = 1.0 / temperature
    TM = _pick_row_tile(B) if tm is None else int(tm)
    assert B % TM == 0, "row tile must divide the batch size"
    nt = B // TM

    cparams = pltpu.CompilerParams(
        dimension_semantics=("parallel",),
        vmem_limit_bytes=32 << 20,
    )

    # ---- pass 1: stream the (B, B) logits once, emit three (B, 1) vectors --
    k1 = functools.partial(_row_stats_kernel, inv_temperature=inv_temperature)
    s, p, ep = pl.pallas_call(
        k1,
        out_shape=(
            jax.ShapeDtypeStruct((B, 1), jnp.float32),
            jax.ShapeDtypeStruct((B, 1), jnp.float32),
            jax.ShapeDtypeStruct((B, 1), jnp.float32),
        ),
        grid=(nt,),
        in_specs=[pl.BlockSpec((TM, B), lambda i: (i, 0))],
        out_specs=(
            pl.BlockSpec((TM, 1), lambda i: (i, 0)),
            pl.BlockSpec((TM, 1), lambda i: (i, 0)),
            pl.BlockSpec((TM, 1), lambda i: (i, 0)),
        ),
        compiler_params=cparams,
        cost_estimate=pl.CostEstimate(
            flops=4 * B * B,
            transcendentals=B * B + B,
            bytes_accessed=B * B * logits.dtype.itemsize + 3 * B * 4,
        ),
    )(logits)                                     # native dtype; cast in-kernel

    ep_row = ep.reshape(1, B)                     # tiny B-element relayout in XLA

    # ---- pass 2: B^2 logs from the resident B-vectors, no HBM re-read ------
    k2 = functools.partial(_row_loss_kernel, batch=B)
    row_partials = pl.pallas_call(
        k2,
        out_shape=jax.ShapeDtypeStruct((B, 1), jnp.float32),
        grid=(nt,),
        in_specs=[
            pl.BlockSpec((TM, 1), lambda i: (i, 0)),
            pl.BlockSpec((TM, 1), lambda i: (i, 0)),
            pl.BlockSpec((1, B), lambda i: (0, 0)),   # same block index -> fetched once
        ],
        out_specs=pl.BlockSpec((TM, 1), lambda i: (i, 0)),
        compiler_params=cparams,
        cost_estimate=pl.CostEstimate(
            flops=3 * B * B,
            transcendentals=B * B,
            bytes_accessed=4 * B * 4,
        ),
    )(s, p, ep_row)

    return jnp.sum(row_partials) / jnp.float32(B * B)


def _infonce_ref(logits, temperature=1.0):
    """Pure-JAX reference mirroring the PyTorch forward exactly."""
    logits = logits.astype(jnp.float32)
    positives = jnp.diag(logits)                                    # (B,)
    scaled = logits / temperature
    numerator = jnp.exp(positives)[:, None]                         # (B, 1)
    denominator = jnp.exp(scaled).sum(axis=1, keepdims=True) - jnp.exp(positives)
    return -jnp.log(numerator / denominator).mean()


if __name__ == "__main__":
    key = jax.random.PRNGKey(0)

    # Test 1: B = 8, single tile, temperature = 1.0 (small-magnitude logits so
    # the faithfully-reproduced denominator quirk stays positive).
    B1 = 8
    logits1 = 0.5 * jax.random.normal(key, (B1, B1), dtype=jnp.float32)
    loss1 = jax.block_until_ready(infonce_loss(logits1, 1.0))
    ref1 = _infonce_ref(logits1, 1.0)
    assert jnp.allclose(loss1, ref1, rtol=1e-4, atol=1e-4), (loss1, ref1)

    # Test 2: B = 16 with a forced TM = 8 to exercise the multi-tile grid path.
    B2 = 16
    key2 = jax.random.PRNGKey(1)
    logits2 = jnp.clip(0.5 * jax.random.normal(key2, (B2, B2), dtype=jnp.float32),
                       -1.0, 1.0)
    loss2 = jax.block_until_ready(infonce_loss(logits2, 1.0, tm=8))
    ref2 = _infonce_ref(logits2, 1.0)
    assert jnp.allclose(loss2, ref2, rtol=1e-4, atol=1e-4), (loss2, ref2)

    # Test 3: B = 256, auto tile, temperature != 1.0 (exercises the scaled path
    # and full-vreg (multiple-of-128) lane extents).
    B3 = 256
    key3 = jax.random.PRNGKey(2)
    logits3 = jnp.clip(0.25 * jax.random.normal(key3, (B3, B3), dtype=jnp.float32),
                       -1.0, 1.0)
    loss3 = jax.block_until_ready(infonce_loss(logits3, 0.5))
    ref3 = _infonce_ref(logits3, 0.5)
    assert jnp.allclose(loss3, ref3, rtol=1e-4, atol=1e-4), (loss3, ref3)

    print("KERNEL_OK")
</pallas_src>

<mosaic_0001>
module attributes {stable_mosaic.version = 11 : i64} {
  func.func @_row_stats_kernel(%arg0: i32, %arg1: memref<8x8xf32, #tpu.memory_space<vmem>>, %arg2: memref<8x1xf32, #tpu.memory_space<vmem>>, %arg3: memref<8x1xf32, #tpu.memory_space<vmem>>, %arg4: memref<8x1xf32, #tpu.memory_space<vmem>>) attributes {dimension_semantics = [#tpu.dimension_semantics<parallel>], iteration_bounds = array<i64: 1>, scalar_prefetch = 0 : i64, scratch_operands = 0 : i64, tpu.core_type = #tpu.core_type<tc>, window_params = [{transform_indices = @transform_0, window_bounds = array<i64: 8, 8>}, {transform_indices = @transform_1, window_bounds = array<i64: 8, 1>}, {transform_indices = @transform_2, window_bounds = array<i64: 8, 1>}, {transform_indices = @transform_3, window_bounds = array<i64: 8, 1>}]} {
    %c0 = arith.constant 0 : index
    %c0_0 = arith.constant 0 : index
    %0 = vector.load %arg1[%c0, %c0_0] : memref<8x8xf32, #tpu.memory_space<vmem>>, vector<8x8xf32>
    %1 = tpu.iota {dimensions = array<i32: 0>} : vector<8x8xi32>
    %2 = tpu.iota {dimensions = array<i32: 1>} : vector<8x8xi32>
    %c8_i32 = arith.constant 8 : i32
    %3 = arith.muli %arg0, %c8_i32 : i32
    %4 = vector.broadcast %3 : i32 to vector<8x8xi32>
    %5 = arith.addi %1, %4 : vector<8x8xi32>
    %6 = arith.cmpi eq, %2, %5 : vector<8x8xi32>
    %cst = arith.constant 0.000000e+00 : f32
    %7 = vector.broadcast %cst : f32 to vector<8x8xf32>
    %8 = arith.select %6, %0, %7 : vector<8x8xi1>, vector<8x8xf32>
    %cst_1 = arith.constant dense<0.000000e+00> : vector<8xf32>
    %9 = vector.multi_reduction <add>, %8, %cst_1 [1] : vector<8x8xf32> to vector<8xf32>
    %10 = vector.shape_cast %9 : vector<8xf32> to vector<8x1xf32>
    %11 = math.exp %0 : vector<8x8xf32>
    %cst_2 = arith.constant dense<0.000000e+00> : vector<8xf32>
    %12 = vector.multi_reduction <add>, %11, %cst_2 [1] : vector<8x8xf32> to vector<8xf32>
    %13 = vector.shape_cast %12 : vector<8xf32> to vector<8x1xf32>
    %c0_3 = arith.constant 0 : index
    %c0_4 = arith.constant 0 : index
    %14 = vector.load %arg2[%c0_3, %c0_4] : memref<8x1xf32, #tpu.memory_space<vmem>>, vector<8x1xf32>
    tpu.vector_store %arg2[%c0_3, %c0_4], %13 {strides = array<i32>} : memref<8x1xf32, #tpu.memory_space<vmem>>, vector<8x1xf32>,
    %c0_5 = arith.constant 0 : index
    %c0_6 = arith.constant 0 : index
    %15 = vector.load %arg3[%c0_5, %c0_6] : memref<8x1xf32, #tpu.memory_space<vmem>>, vector<8x1xf32>
    tpu.vector_store %arg3[%c0_5, %c0_6], %10 {strides = array<i32>} : memref<8x1xf32, #tpu.memory_space<vmem>>, vector<8x1xf32>,
    %16 = math.exp %10 : vector<8x1xf32>
    %c0_7 = arith.constant 0 : index
    %c0_8 = arith.constant 0 : index
    %17 = vector.load %arg4[%c0_7, %c0_8] : memref<8x1xf32, #tpu.memory_space<vmem>>, vector<8x1xf32>
    tpu.vector_store %arg4[%c0_7, %c0_8], %16 {strides = array<i32>} : memref<8x1xf32, #tpu.memory_space<vmem>>, vector<8x1xf32>,
    return
  }
  func.func @transform_0(%arg0: i32) -> (i32, i32) {
    %c0_i32 = arith.constant 0 : i32
    %c0_i32_0 = arith.constant 0 : i32
    return %arg0, %c0_i32 : i32, i32
  }
  func.func @transform_1(%arg0: i32) -> (i32, i32) {
    %c0_i32 = arith.constant 0 : i32
    %c0_i32_0 = arith.constant 0 : i32
    return %arg0, %c0_i32 : i32, i32
  }
  func.func @transform_2(%arg0: i32) -> (i32, i32) {
    %c0_i32 = arith.constant 0 : i32
    %c0_i32_0 = arith.constant 0 : i32
    return %arg0, %c0_i32 : i32, i32
  }
  func.func @transform_3(%arg0: i32) -> (i32, i32) {
    %c0_i32 = arith.constant 0 : i32
    %c0_i32_0 = arith.constant 0 : i32
    return %arg0, %c0_i32 : i32, i32
  }
}

</mosaic_0001>

<bundles_post_ra>
// kernel: tpu_custom_call.1
= control target key start
LH: loop header
LB: loop body
LE: loop exit
PB: predicated region body
PF: predicated region fallthrough
CT: control target
= control target key end

     0   :  { %9 = vsyncpa [#allocation3], 0  ;;  %s88_s12 = smov [#allocation2]   ;;  %s121_s0 = inlined_call_operand.hbm [shape: f32[8,8], index: 0, kind: input, shape index: {}]   ;;  %s122_s1 = inlined_call_operand.vmem [shape: f32[8,1], index: 1, kind: output, shape index: {0}]   ;;  %s123_s2 = inlined_call_operand.vmem [shape: f32[8,1], index: 2, kind: output, shape index: {1}]   ;;  %s124_s3 = inlined_call_operand.vmem [shape: f32[8,1], index: 3, kind: output, shape index: {2}]  }
   0x1   :  { %s16_s13 = sshll.u32 %s88_s12, 4  ;;  %s17_s13 = int_to_ptr.vmem [resolvable:$true] %s16_s13 }
   0x2   :  { %s74_s14 = scalar_lea.vmem %s17_s13, 128  ;;  %p79_p1 = scmp.lt.s32.totalorder %s17_s13, %s17_s13 }
   0x3   :  { %p75_p0 = scmp.ne.s32.totalorder %s17_s13, %s74_s14  ;;  %p80_p2 = scmp.lt.s32.totalorder %s74_s14, %s74_s14 }
   0x5   :  { %p81_p3 = por %p80_p2, %p79_p1 }
   0x7   :  { %p82_p4 = pnand %p81_p3, %p75_p0 }
   0x9   :  { %85 = shalt.err (!%p82_p4)
}
   0xa   :  { %19 = dma.hbm_to_vmem [thread:$0]  %s121_s0, 128, %s17_s13, [#allocation3]  }
   0xb   :  { %86 = dma.done.wait [#allocation3], 128  }
   0xc   :  { %87 = vsyncadd [#allocation3], 4294967168  ;;  %v24_v0 = vlaneseq  ;;  %vm33_vm1 = vcmask 64512   ;;  %v23_v3 = vld [vmem:[#allocation2] sm:$0xff]  ;;  %vm42_vm2 = vcmask 7168  }
   0xd   :  { %v37_v5 = vmul.f32 1.442695, %v23_v3 }
   0xe   :  { %v25_v1 = vshrl.u32 %v24_v0, 7  ;;  %v27_v2 = vand.u32 127, %v24_v0 }
   0xf   :  { %62 = vpow2.f32 %v37_v5 }
  0x10   :  { %vm31_vm0 = vcmp.eq.s32.totalorder %v27_v2, %v25_v1 }
  0x11   :  { %v32_v4 = vsel %vm31_vm0, %v23_v3, 0.0 }
  0x12   :  { %v34_v6 = vsel %vm33_vm1, %v32_v4, 0.0 }
  0x13   :  { %35 = vadd.xlane.f32.xlu0 %v34_v6 }
  0x1c   :  { %v63_v7 = vpop.eup %62 }
  0x1d   :  { %v39_v8 = vsel %vm33_vm1, %v63_v7, 0.0 }
  0x1e   :  { %40 = vadd.xlane.f32.xlu0 %v39_v8 }
  0x9c   :  { %v36_v9 = vpop.xlane.xlu0 %35 }
  0x9d   :  { %44 = vst.msk [vmem:[%s123_s2] sm:$0xff] %vm42_vm2, %v36_v9  ;;  %v45_v10 = vmul.f32 1.442695, %v36_v9 }
  0x9f   :  { %64 = vpow2.f32 %v45_v10 }
  0xa7   :  { %v41_v11 = vpop.xlane.xlu0 %40 }
  0xa8   :  { %43 = vst.msk [vmem:[%s122_s1] sm:$0xff] %vm42_vm2, %v41_v11 }
  0xac   :  { %v65_v12 = vpop.eup %64 }
  0xad   :  { %47 = vst.msk [vmem:[%s124_s3] sm:$0xff] %vm42_vm2, %v65_v12 }
  0xae   :  { %60 = vsyncpa [#allocation3], 1 }

</bundles_post_ra>
